<compile_context>
chip_gen: v7x
topology: tpu7x:2x2x1
jax: 0.10.0
libtpu: 0.0.40
codegen_flags: <defaults>
</compile_context>

<pallas_src>
import functools

import jax
import jax.numpy as jnp
from jax import lax
from jax.experimental import pallas as pl
from jax.experimental.pallas import tpu as pltpu

_LANE = 128
_MIN_SPLIT_BYTES = 512 * 1024        # above this, force grid >= 2 (v7x 2 TCs)
_INV_SQRT2 = 0.7071067811865476

_SUPPORTED_ACTS = ("relu", "tanh", "leaky_relu", "elu", "gelu",
                   "sigmoid", "selu", "softplus")
_TRANSCENDENTAL_ACTS = frozenset(
    {"tanh", "elu", "gelu", "sigmoid", "selu", "softplus"})
# Pure-VPU activations: keep native dtype (bf16 VALU on v6e/v7x; compiler
# handles v5e). Matches torch native-dtype math exactly for these two.
_NATIVE_DTYPE_ACTS = frozenset({"relu", "leaky_relu"})


def _cdiv(a, b):
    return -(-a // b)


def _apply_activation(x, activation_type):
    """Elementwise activation matching torch defaults."""
    if activation_type == "relu":
        return jnp.maximum(x, 0.0)
    if activation_type == "tanh":
        return jnp.tanh(x)
    if activation_type == "leaky_relu":
        return jnp.where(x >= 0.0, x, 0.01 * x)
    if activation_type == "elu":
        return jnp.where(x > 0.0, x, jnp.expm1(x))
    if activation_type == "gelu":
        # torch F.gelu default: exact erf formulation
        return 0.5 * x * (1.0 + lax.erf(x * _INV_SQRT2))
    if activation_type == "sigmoid":
        # Exact sigmoid via tanh: keeps the transcendental on the EUP slot and
        # avoids the f32 VALU divide of 1/(1+exp(-x)).
        return 0.5 * (1.0 + jnp.tanh(0.5 * x))
    if activation_type == "selu":
        alpha = 1.6732632423543772848170429916717
        scale = 1.0507009873554804934193349852946
        return scale * jnp.where(x > 0.0, x, alpha * jnp.expm1(x))
    if activation_type == "softplus":
        # torch: beta=1, threshold=20 -> linear above threshold. The clamp also
        # keeps OOB lanes of a ragged last block from overflowing (they are
        # masked out on store anyway).
        safe = jnp.minimum(x, 20.0)
        return jnp.where(x > 20.0, x, jnp.log1p(jnp.exp(safe)))
    raise ValueError(f"Unsupported activation: {activation_type}")


def _activation_kernel(x_ref, o_ref, *, activation_type):
    x = x_ref[...]
    if activation_type not in _NATIVE_DTYPE_ACTS:
        x = x.astype(jnp.float32)
    o_ref[...] = _apply_activation(x, activation_type).astype(o_ref.dtype)


@functools.lru_cache(maxsize=1)
def _vmem_budget():
    """(per-buffer block byte target, vmem_limit_bytes), generation-aware."""
    physical = 64 * 1024 * 1024          # conservative default (v7x per-TC)
    try:
        info = pltpu.get_tpu_info()
        cap = int(getattr(info, "vmem_capacity_bytes", physical))
        if cap > 0:
            physical = cap
    except Exception:                    # no hardware query available
        pass
    vmem_limit = min(64 * 1024 * 1024, (physical * 3) // 4)
    # in + out, each double-buffered = 4 live blocks; keep well under limit.
    block_bytes = max(2 * 1024 * 1024, min(8 * 1024 * 1024, vmem_limit // 6))
    return block_bytes, vmem_limit


def _plan_tiling(n, dtype, target_block_bytes):
    """Pick (rows, lane, tile_rows, grid) for an n-element flat tensor."""
    itemsize = jnp.dtype(dtype).itemsize
    # dtype-aware sublane packing: f32 -> 8-row align, bf16 -> 16, int8 -> 32
    row_align = 8 * max(1, 4 // itemsize)

    # Widest lane count that divides n exactly (no pad path); else 128 + tail.
    lane = _LANE
    for cand in (1024, 512, 256):
        if n % cand == 0:
            lane = cand
            break
    rows = _cdiv(n, lane)
    total_bytes = rows * lane * itemsize

    if total_bytes <= _MIN_SPLIT_BYTES:
        # Single block: full-extent block shape, no pipeline bookkeeping.
        return rows, lane, rows, 1

    # Large input: cap tile at the per-buffer target AND at half the slab so
    # the grid has >= 2 steps ("parallel" axis shards across v7x's two TCs).
    target_rows = max(row_align, target_block_bytes // (lane * itemsize))
    cap = max(row_align, min(target_rows, _cdiv(rows, 2)))
    tile_rows = max(row_align, (cap // row_align) * row_align)
    tile_rows = min(tile_rows, rows)
    grid = _cdiv(rows, tile_rows)

    # Best-effort: make the step count even for 2-TC load balance.
    if grid > 1 and grid % 2 == 1:
        alt = _cdiv(_cdiv(rows, grid + 1), row_align) * row_align
        if alt >= row_align and _cdiv(rows, alt) % 2 == 0:
            tile_rows = alt
            grid = _cdiv(rows, alt)
    return rows, lane, tile_rows, grid


def non_linear_layer(x, activation_type="relu"):
    """Pallas implementation of NonLinearLayer.forward(x)."""
    if activation_type not in _SUPPORTED_ACTS:
        raise ValueError(f"Unsupported activation: {activation_type}")

    orig_shape = x.shape
    orig_dtype = x.dtype
    flat = x.reshape(-1)
    n = flat.shape[0]
    if n == 0:
        return x

    block_bytes, vmem_limit = _vmem_budget()
    rows, lane, tile_rows, grid = _plan_tiling(n, orig_dtype, block_bytes)

    n_pad = rows * lane
    if n_pad != n:
        # Tail-only pad (< lane elements); only hit when n % 128 != 0.
        flat = jnp.pad(flat, (0, n_pad - n))
    x2d = flat.reshape(rows, lane)

    kernel = functools.partial(_activation_kernel,
                               activation_type=activation_type)
    itemsize = jnp.dtype(orig_dtype).itemsize
    cost = pl.CostEstimate(
        flops=n,
        transcendentals=n if activation_type in _TRANSCENDENTAL_ACTS else 0,
        bytes_accessed=2 * n * itemsize,
    )

    out2d = pl.pallas_call(
        kernel,
        out_shape=jax.ShapeDtypeStruct((rows, lane), orig_dtype),
        grid_spec=pltpu.PrefetchScalarGridSpec(
            num_scalar_prefetch=0,
            grid=(grid,),
            # Ragged last block (rows % tile_rows != 0) is handled by Pallas:
            # masked store on the final step, no wrapper-side pad/slice copies.
            in_specs=[pl.BlockSpec((tile_rows, lane), lambda i: (i, 0))],
            out_specs=pl.BlockSpec((tile_rows, lane), lambda i: (i, 0)),
        ),
        compiler_params=pltpu.CompilerParams(
            dimension_semantics=("parallel",),
            vmem_limit_bytes=vmem_limit,
        ),
        cost_estimate=cost,
    )(x2d)

    out_flat = out2d.reshape(-1)
    if n_pad != n:
        out_flat = out_flat[:n]
    return out_flat.reshape(orig_shape)


def _reference(x, activation_type):
    if activation_type in _NATIVE_DTYPE_ACTS:
        return _apply_activation(x, activation_type).astype(x.dtype)
    xf = x.astype(jnp.float32)
    return _apply_activation(xf, activation_type).astype(x.dtype)


if __name__ == "__main__":
    key = jax.random.PRNGKey(0)
    k0, k1, k2 = jax.random.split(key, 3)

    ok = True

    # Primary NCHW test shape (single-block fast path).
    x_main = jax.random.normal(k0, (2, 4, 16, 16), dtype=jnp.float32) * 3.0
    for act in _SUPPORTED_ACTS:
        out = jax.block_until_ready(non_linear_layer(x_main, act))
        ref = _reference(x_main, act)
        if not jnp.allclose(out, ref, atol=1e-5, rtol=1e-5):
            ok = False
            print(f"MISMATCH in activation (main): {act}")

    # Ragged flat size (n % 128 != 0) -> exercises the tiny tail-pad path.
    x_rag = jax.random.normal(k1, (3, 5, 7, 11), dtype=jnp.float32) * 3.0
    for act in ("relu", "gelu", "softplus"):
        out = jax.block_until_ready(non_linear_layer(x_rag, act))
        ref = _reference(x_rag, act)
        if not jnp.allclose(out, ref, atol=1e-5, rtol=1e-5):
            ok = False
            print(f"MISMATCH in activation (ragged-n): {act}")

    # >512 KB input -> multi-step grid with a ragged last block (masked store).
    x_big = jax.random.normal(k2, (2, 4, 96, 200), dtype=jnp.float32) * 3.0
    for act in ("relu", "gelu"):
        out = jax.block_until_ready(non_linear_layer(x_big, act))
        ref = _reference(x_big, act)
        if not jnp.allclose(out, ref, atol=1e-5, rtol=1e-5):
            ok = False
            print(f"MISMATCH in activation (multi-block): {act}")

    if ok:
        print("KERNEL_OK")
</pallas_src>

<mosaic_0001>
module attributes {stable_mosaic.version = 11 : i64} {
  func.func @_activation_kernel(%arg0: i32, %arg1: memref<2x1024xf32, #tpu.memory_space<vmem>>, %arg2: memref<2x1024xf32, #tpu.memory_space<vmem>>) attributes {dimension_semantics = [#tpu.dimension_semantics<parallel>], iteration_bounds = array<i64: 1>, scalar_prefetch = 0 : i64, scratch_operands = 0 : i64, tpu.core_type = #tpu.core_type<tc>, window_params = [{transform_indices = @transform_0, window_bounds = array<i64: 2, 1024>}, {transform_indices = @transform_1, window_bounds = array<i64: 2, 1024>}]} {
    %c0 = arith.constant 0 : index
    %c0_0 = arith.constant 0 : index
    %0 = vector.load %arg1[%c0, %c0_0] : memref<2x1024xf32, #tpu.memory_space<vmem>>, vector<2x1024xf32>
    %cst = arith.constant 0.000000e+00 : f32
    %1 = vector.broadcast %cst : f32 to vector<2x1024xf32>
    %2 = arith.maximumf %0, %1 : vector<2x1024xf32>
    %c0_1 = arith.constant 0 : index
    %c0_2 = arith.constant 0 : index
    %3 = vector.load %arg2[%c0_1, %c0_2] : memref<2x1024xf32, #tpu.memory_space<vmem>>, vector<2x1024xf32>
    tpu.vector_store %arg2[%c0_1, %c0_2], %2 {strides = array<i32>} : memref<2x1024xf32, #tpu.memory_space<vmem>>, vector<2x1024xf32>,
    return
  }
  func.func @transform_0(%arg0: i32) -> (i32, i32) {
    %c0_i32 = arith.constant 0 : i32
    %c0_i32_0 = arith.constant 0 : i32
    return %arg0, %c0_i32 : i32, i32
  }
  func.func @transform_1(%arg0: i32) -> (i32, i32) {
    %c0_i32 = arith.constant 0 : i32
    %c0_i32_0 = arith.constant 0 : i32
    return %arg0, %c0_i32 : i32, i32
  }
}

</mosaic_0001>

<bundles_post_ra>
// kernel: tpu_custom_call.1
= control target key start
LH: loop header
LB: loop body
LE: loop exit
PB: predicated region body
PF: predicated region fallthrough
CT: control target
= control target key end

     0   :  { %6 = vsyncpa [#allocation3], 0  ;;  %s128_s0 = inlined_call_operand.hbm [shape: f32[2,1024], index: 0, kind: input, shape index: {}]   ;;  %s129_s1 = inlined_call_operand.hbm [shape: f32[2,1024], index: 1, kind: output, shape index: {}]  }
   0x1   :  { %7 = vsyncpa [#allocation4], 0  ;;  %s92_s6 = smov [#allocation2]   ;;  %s44_s10 = scalar_lea.hbm %s128_s0, 256 }
   0x2   :  { %s14_s7 = sshll.u32 %s92_s6, 4  ;;  %p45_p0 = scmp.ne.s32.totalorder %s128_s0, %s44_s10  ;;  %s15_s7 = int_to_ptr.vmem [resolvable:$true] %s14_s7 }
   0x3   :  { %p48_p1 = scmp.lt.u32.totalorder %s44_s10, %s128_s0 }
   0x5   :  { %p50_p2 = pnand %p48_p1, %p45_p0 }
   0x7   :  { %53 = shalt.err (!%p50_p2)
}
   0x8   :  { %s54_s15 = scalar_lea.vmem %s15_s7, 256  ;;  %p59_p4 = scmp.lt.s32.totalorder %s15_s7, %s15_s7 }
   0x9   :  { %p55_p3 = scmp.ne.s32.totalorder %s15_s7, %s54_s15  ;;  %p60_p5 = scmp.lt.s32.totalorder %s54_s15, %s54_s15 }
   0xb   :  { %p61_p6 = por %p60_p5, %p59_p4 }
   0xd   :  { %p62_p7 = pnand %p61_p6, %p55_p3 }
   0xf   :  { %65 = shalt.err (!%p62_p7)
}
  0x10   :  { %17 = dma.hbm_to_vmem [thread:$0]  %s128_s0, 256, %s15_s7, [#allocation3]  }
  0x11   :  { %88 = dma.done.wait [#allocation3], 256  }
  0x12   :  { %89 = vsyncadd [#allocation3], 4294967040  ;;  %s93_s18 = smov [#allocation5]   ;;  %v21_v0 = vld [vmem:[#allocation2] sm:$0xff]  ;;  %v22_v1 = vld [vmem:[#allocation2 + $0x8] sm:$0xff] }
  0x13   :  { %s33_s19 = sshll.u32 %s93_s18, 4  ;;  %v23_v2 = vmax.f32 %v21_v0, 0.0  ;;  %v24_v3 = vmax.f32 %v22_v1, 0.0  ;;  %s34_s19 = int_to_ptr.vmem [resolvable:$true] %s33_s19 }
  0x14   :  { %s66_s20 = scalar_lea.vmem %s34_s19, 256  ;;  %p71_p9 = scmp.lt.s32.totalorder %s34_s19, %s34_s19 }
  0x15   :  { %25 = vst [vmem:[#allocation5] sm:$0xff] %v23_v2  ;;  %26 = vst [vmem:[#allocation5 + $0x8] sm:$0xff] %v24_v3  ;;  %p67_p8 = scmp.ne.s32.totalorder %s34_s19, %s66_s20  ;;  %p72_p10 = scmp.lt.s32.totalorder %s66_s20, %s66_s20 }
  0x17   :  { %p73_p11 = por %p72_p10, %p71_p9 }
  0x19   :  { %p74_p12 = pnand %p73_p11, %p67_p8 }
  0x1b   :  { %77 = shalt.err (!%p74_p12)
}
  0x1c   :  { %s78_s22 = scalar_lea.hbm %s129_s1, 256 }
  0x1d   :  { %p79_p13 = scmp.ne.s32.totalorder %s129_s1, %s78_s22  ;;  %p82_p0 = scmp.lt.u32.totalorder %s78_s22, %s129_s1 }
  0x1f   :  { %p84_p1 = pnand %p82_p0, %p79_p13 }
  0x21   :  { %87 = shalt.err (!%p84_p1)
}
  0x22   :  { %36 = dma.vmem_to_hbm [thread:$0]  %s34_s19, 256, %s129_s1, [#allocation4]  }
  0x23   :  { %90 = dma.done.wait [#allocation4], 256  }
  0x24   :  { %91 = vsyncadd [#allocation4], 4294967040 }
  0x25   :  { %40 = vsyncpa [#allocation3], 1 }
  0x26   :  { %41 = vsyncpa [#allocation4], 1 }

</bundles_post_ra>
